<compile_context>
chip_gen: v5e
topology: v5e:2x2
jax: 0.10.0
libtpu: 0.0.40
codegen_flags: <defaults>
</compile_context>

<pallas_src>
import functools

import jax
import jax.numpy as jnp
from jax.experimental import pallas as pl
from jax.experimental.pallas import tpu as pltpu


# ----------------------------------------------------------------------------- kernel
def _mlp_fused_kernel(x_ref, *refs, activation: str, n_layers: int):
    """Fused MLP: h = x; for each layer: h = act(h @ w + b); o = h.

    x_ref : (TM, D_in)       VMEM
    refs  : w_0, b_0, ..., w_{L-1}, b_{L-1}, o_ref
            w_i : (D_i, D_{i+1}) VMEM, bf16 (pre-transposed vs torch (out, in))
            b_i : (1,  D_{i+1})  VMEM, f32
            o   : (TM, D_out)    VMEM
    """
    o_ref = refs[-1]
    wb = refs[:-1]

    # bf16 MXU operands; inter-layer activation carried in bf16, accumulate / bias /
    # activation math kept in f32.
    h = x_ref[...].astype(jnp.bfloat16)
    for i in range(n_layers):
        w = wb[2 * i][...]        # (D_i, D_{i+1}) bf16
        b = wb[2 * i + 1][...]    # (1, D_{i+1})   f32
        y = jnp.dot(h, w, preferred_element_type=jnp.float32) + b
        if activation == "tanh":
            y = jnp.tanh(y)       # EUP slot: effectively free next to the MXU
        elif activation == "relu":
            y = jnp.maximum(y, 0.0)
        elif activation == "sigmoid":
            y = jax.nn.sigmoid(y)
        else:
            raise ValueError(f"unknown activation {activation!r}")
        if i + 1 < n_layers:
            h = y.astype(jnp.bfloat16)     # bf16 carry between layers
        else:
            o_ref[...] = y.astype(o_ref.dtype)


# ---------------------------------------------------------------------------- wrapper
def _round_up(x, m):
    return ((x + m - 1) // m) * m


def _cdiv(a, b):
    return -(-a // b)


def _choose_batch_tiling(B, tm_max=2048, min_rows=8):
    """Pick (tile_rows, num_tiles).

    Padding-aware (tile derived from cdiv(B, n) instead of padding B up to a fixed
    multiple), and the tile count is forced to an even number >= 2 whenever the batch
    is big enough, so v7x's two TensorCores split the "parallel" axis evenly.
    """
    if B <= min_rows:
        return min_rows, 1
    n = max(1, _cdiv(B, tm_max))
    if B >= 2 * min_rows:
        n = max(n, 2)
        if n % 2:
            n += 1
    tile = _round_up(_cdiv(B, n), min_rows)
    n = _cdiv(B, tile)
    if n > 1 and n % 2:
        n += 1
    return tile, n


def mlp_forward(x, params, activation="tanh", tm=2048, out_dtype=jnp.bfloat16):
    """Fused MLP forward.

    x      : (B, D_in)                       f32 (or bf16)
    params : [(w_t, b), ...] with w_t (D_i, D_{i+1}) bf16, b (1, D_{i+1}) f32
    Returns (B, D_out) in out_dtype (bf16 by default to halve output HBM traffic;
    pass jnp.float32 for f32 outputs).
    """
    B, D_in = x.shape
    n_layers = len(params)
    D_out = params[-1][0].shape[1]

    tm_eff, n_tiles = _choose_batch_tiling(B, tm_max=tm)
    B_pad = tm_eff * n_tiles
    if B_pad != B:
        x = jnp.pad(x, ((0, B_pad - B), (0, 0)))
    grid = (n_tiles,)

    # x / out are tiled over the batch; weights & biases are full blocks with a
    # constant index_map so they stay VMEM-resident across all grid steps.
    in_specs = [pl.BlockSpec((tm_eff, D_in), lambda i: (i, 0))]
    flat_wb = []
    for w_t, b in params:
        # For wide-hidden variants (esp. v7x, 64 MiB VMEM) add
        # pipeline_mode=pl.Buffered(1) to these constant-index specs; at ~40 KB of
        # weights here double-buffering costs nothing, so keep the default.
        in_specs.append(pl.BlockSpec(w_t.shape, lambda i: (0, 0)))
        in_specs.append(pl.BlockSpec(b.shape, lambda i: (0, 0)))
        flat_wb.extend([w_t, b])
    out_spec = pl.BlockSpec((tm_eff, D_out), lambda i: (i, 0))

    # Explicit VMEM budget: double-buffered x/out tiles + (double-buffered) params,
    # with 2x headroom, clamped to the 32 MiB scoped ceiling (safe on v5e/v6e/v7x).
    def _nbytes(shape, dt):
        sz = 1
        for s in shape:
            sz *= int(s)
        return sz * jnp.dtype(dt).itemsize

    vmem_needed = (2 * _nbytes((tm_eff, D_in), x.dtype)
                   + 2 * _nbytes((tm_eff, D_out), out_dtype))
    for w_t, b in params:
        vmem_needed += 2 * (_nbytes(w_t.shape, w_t.dtype) + _nbytes(b.shape, b.dtype))
    vmem_limit = int(min(32 * 1024 * 1024, max(4 * 1024 * 1024, 2 * vmem_needed)))

    kernel = functools.partial(
        _mlp_fused_kernel, activation=activation, n_layers=n_layers
    )
    out = pl.pallas_call(
        kernel,
        out_shape=jax.ShapeDtypeStruct((B_pad, D_out), out_dtype),
        grid=grid,
        in_specs=in_specs,
        out_specs=out_spec,
        compiler_params=pltpu.CompilerParams(
            dimension_semantics=("parallel",),   # lets v7x shard batch tiles over 2 TCs
            vmem_limit_bytes=vmem_limit,
        ),
    )(x, *flat_wb)
    return out[:B]


# ------------------------------------------------------------------------------- init
def init_mlp_params(key, input_dim, hidden_dims=(128, 128)):
    """PyTorch nn.Linear-style init (uniform +-1/sqrt(fan_in)), kept in f32.

    Weights are stored pre-transposed as (in_features, out_features); biases have
    shape (1, out_features). Cast weights to bf16 once (load time) for the kernel.
    """
    params = []
    last_dim = input_dim
    for nh in hidden_dims:
        key, kw, kb = jax.random.split(key, 3)
        bound = 1.0 / float(jnp.sqrt(jnp.asarray(last_dim, dtype=jnp.float32)))
        w_t = jax.random.uniform(kw, (last_dim, nh), dtype=jnp.float32,
                                 minval=-bound, maxval=bound)
        b = jax.random.uniform(kb, (1, nh), dtype=jnp.float32,
                               minval=-bound, maxval=bound)
        params.append((w_t, b))
        last_dim = nh
    return params


# ------------------------------------------------------------------------------- main
if __name__ == "__main__":
    key = jax.random.PRNGKey(0)
    k_x, k_x2, k_p = jax.random.split(key, 3)

    # Small shapes consistent with the module: input_dim=32, hidden=(128, 128).
    batch, input_dim = 8, 32
    hidden_dims = (128, 128)

    params_f32 = init_mlp_params(k_p, input_dim, hidden_dims)          # torch-style f32
    params = [(w.astype(jnp.bfloat16), b) for w, b in params_f32]      # kernel operands

    def ref_f32(xv):
        h = xv
        for w, b in params_f32:
            h = jnp.tanh(jnp.dot(h, w) + b)
        return h

    def ref_matched(xv):  # same bf16-operand / f32-accumulate / bf16-carry math
        h = xv.astype(jnp.bfloat16)
        for i, (w, b) in enumerate(params):
            y = jnp.tanh(jnp.dot(h, w, preferred_element_type=jnp.float32) + b)
            h = y.astype(jnp.bfloat16)
        return h

    for B in (batch, 37):  # 37 exercises the padding-aware / even-step tiling path
        kx = k_x if B == batch else k_x2
        x = jax.random.normal(kx, (B, input_dim), dtype=jnp.float32)

        out = mlp_forward(x, params, activation="tanh")
        out = jax.block_until_ready(out)

        assert out.shape == (B, hidden_dims[-1]), out.shape
        assert out.dtype == jnp.bfloat16, out.dtype

        out_f = out.astype(jnp.float32)
        # Exact-math reference (bit-for-bit up to MXU accumulation order).
        rm = ref_matched(x).astype(jnp.float32)
        assert jnp.allclose(out_f, rm, atol=2e-3, rtol=0), (
            "matched-ref max err:", float(jnp.max(jnp.abs(out_f - rm))))
        # True f32 (PyTorch-semantics) reference, tolerance covering bf16 rounding.
        r32 = ref_f32(x)
        assert jnp.allclose(out_f, r32, atol=5e-2, rtol=0), (
            "f32-ref max err:", float(jnp.max(jnp.abs(out_f - r32))))

    print("KERNEL_OK")
</pallas_src>

<mosaic_0001>
module attributes {stable_mosaic.version = 11 : i64} {
  func.func @_mlp_fused_kernel(%arg0: i32, %arg1: memref<8x32xf32, #tpu.memory_space<vmem>>, %arg2: memref<32x128xbf16, #tpu.memory_space<vmem>>, %arg3: memref<1x128xf32, #tpu.memory_space<vmem>>, %arg4: memref<128x128xbf16, #tpu.memory_space<vmem>>, %arg5: memref<1x128xf32, #tpu.memory_space<vmem>>, %arg6: memref<8x128xbf16, #tpu.memory_space<vmem>>) attributes {dimension_semantics = [#tpu.dimension_semantics<parallel>], iteration_bounds = array<i64: 1>, scalar_prefetch = 0 : i64, scratch_operands = 0 : i64, tpu.core_type = #tpu.core_type<tc>, window_params = [{transform_indices = @transform_0, window_bounds = array<i64: 8, 32>}, {pipeline_mode = #tpu.pipeline_mode<synchronous>, transform_indices = @transform_1, window_bounds = array<i64: 32, 128>}, {pipeline_mode = #tpu.pipeline_mode<synchronous>, transform_indices = @transform_2, window_bounds = array<i64: 1, 128>}, {pipeline_mode = #tpu.pipeline_mode<synchronous>, transform_indices = @transform_3, window_bounds = array<i64: 128, 128>}, {pipeline_mode = #tpu.pipeline_mode<synchronous>, transform_indices = @transform_4, window_bounds = array<i64: 1, 128>}, {transform_indices = @transform_5, window_bounds = array<i64: 8, 128>}]} {
    %c0 = arith.constant 0 : index
    %c0_0 = arith.constant 0 : index
    %0 = vector.load %arg1[%c0, %c0_0] : memref<8x32xf32, #tpu.memory_space<vmem>>, vector<8x32xf32>
    %1 = arith.truncf %0 : vector<8x32xf32> to vector<8x32xbf16>
    %c0_1 = arith.constant 0 : index
    %c0_2 = arith.constant 0 : index
    %2 = vector.load %arg2[%c0_1, %c0_2] : memref<32x128xbf16, #tpu.memory_space<vmem>>, vector<32x128xbf16>
    %c0_3 = arith.constant 0 : index
    %c0_4 = arith.constant 0 : index
    %3 = vector.load %arg3[%c0_3, %c0_4] : memref<1x128xf32, #tpu.memory_space<vmem>>, vector<1x128xf32>
    %cst = arith.constant dense<0.000000e+00> : vector<8x128xf32>
    %4 = tpu.matmul %1, %2, %cst {dimension_numbers = #tpu.dot_dimension_numbers<[1], [0], [0], [1], [0, 0, 1, 1], [], []>} : vector<8x32xbf16>, vector<32x128xbf16>, vector<8x128xf32> -> vector<8x128xf32>
    %5 = vector.broadcast %3 : vector<1x128xf32> to vector<8x128xf32>
    %6 = arith.addf %4, %5 : vector<8x128xf32>
    %7 = math.tanh %6 : vector<8x128xf32>
    %8 = arith.truncf %7 : vector<8x128xf32> to vector<8x128xbf16>
    %c0_5 = arith.constant 0 : index
    %c0_6 = arith.constant 0 : index
    %9 = vector.load %arg4[%c0_5, %c0_6] : memref<128x128xbf16, #tpu.memory_space<vmem>>, vector<128x128xbf16>
    %c0_7 = arith.constant 0 : index
    %c0_8 = arith.constant 0 : index
    %10 = vector.load %arg5[%c0_7, %c0_8] : memref<1x128xf32, #tpu.memory_space<vmem>>, vector<1x128xf32>
    %cst_9 = arith.constant dense<0.000000e+00> : vector<8x128xf32>
    %11 = tpu.matmul %8, %9, %cst_9 {dimension_numbers = #tpu.dot_dimension_numbers<[1], [0], [0], [1], [0, 0, 1, 1], [], []>} : vector<8x128xbf16>, vector<128x128xbf16>, vector<8x128xf32> -> vector<8x128xf32>
    %12 = vector.broadcast %10 : vector<1x128xf32> to vector<8x128xf32>
    %13 = arith.addf %11, %12 : vector<8x128xf32>
    %14 = math.tanh %13 : vector<8x128xf32>
    %15 = arith.truncf %14 : vector<8x128xf32> to vector<8x128xbf16>
    %c0_10 = arith.constant 0 : index
    %c0_11 = arith.constant 0 : index
    %16 = vector.load %arg6[%c0_10, %c0_11] : memref<8x128xbf16, #tpu.memory_space<vmem>>, vector<8x128xbf16>
    tpu.vector_store %arg6[%c0_10, %c0_11], %15 {strides = array<i32>} : memref<8x128xbf16, #tpu.memory_space<vmem>>, vector<8x128xbf16>,
    return
  }
  func.func @transform_0(%arg0: i32) -> (i32, i32) {
    %c0_i32 = arith.constant 0 : i32
    %c0_i32_0 = arith.constant 0 : i32
    return %arg0, %c0_i32 : i32, i32
  }
  func.func @transform_1(%arg0: i32) -> (i32, i32) {
    %c0_i32 = arith.constant 0 : i32
    %c0_i32_0 = arith.constant 0 : i32
    %c0_i32_1 = arith.constant 0 : i32
    return %c0_i32, %c0_i32_0 : i32, i32
  }
  func.func @transform_2(%arg0: i32) -> (i32, i32) {
    %c0_i32 = arith.constant 0 : i32
    %c0_i32_0 = arith.constant 0 : i32
    %c0_i32_1 = arith.constant 0 : i32
    return %c0_i32, %c0_i32_0 : i32, i32
  }
  func.func @transform_3(%arg0: i32) -> (i32, i32) {
    %c0_i32 = arith.constant 0 : i32
    %c0_i32_0 = arith.constant 0 : i32
    %c0_i32_1 = arith.constant 0 : i32
    return %c0_i32, %c0_i32_0 : i32, i32
  }
  func.func @transform_4(%arg0: i32) -> (i32, i32) {
    %c0_i32 = arith.constant 0 : i32
    %c0_i32_0 = arith.constant 0 : i32
    %c0_i32_1 = arith.constant 0 : i32
    return %c0_i32, %c0_i32_0 : i32, i32
  }
  func.func @transform_5(%arg0: i32) -> (i32, i32) {
    %c0_i32 = arith.constant 0 : i32
    %c0_i32_0 = arith.constant 0 : i32
    return %arg0, %c0_i32 : i32, i32
  }
}

</mosaic_0001>

<bundles_post_ra>
// kernel: tpu_custom_call.1
= control target key start
LH: loop header
LB: loop body
LE: loop exit
PB: predicated region body
PF: predicated region fallthrough
CT: control target
= control target key end

     0   :  { %10 = vsyncpa [#allocation3], 0  ;;  %s429_s0 = inlined_call_operand.hbm [shape: f32[8,32], index: 0, kind: input, shape index: {}]   ;;  %s430_s1 = inlined_call_operand.hbm [shape: bf16[32,128], index: 1, kind: input, shape index: {}]   ;;  %s431_s2 = inlined_call_operand.vmem [shape: f32[1,128], index: 2, kind: input, shape index: {}]   ;;  %s432_s3 = inlined_call_operand.hbm [shape: bf16[128,128], index: 3, kind: input, shape index: {}]   ;;  %s433_s4 = inlined_call_operand.vmem [shape: f32[1,128], index: 4, kind: input, shape index: {}]   ;;  %s434_s5 = inlined_call_operand.hbm [shape: bf16[8,128], index: 5, kind: output, shape index: {}]  }
   0x1   :  { %11 = vsyncpa [#allocation6], 0  ;;  %s28_s20 = sshll.u32 %s430_s1, 4  ;;  %s29_s20 = int_to_ptr.hbm [resolvable:$true] %s28_s20 }
   0x2   :  { %12 = vsyncpa [#allocation4], 0  ;;  %s375_s21 = smov [#allocation5]   ;;  %s18_s25 = sshll.u32 %s429_s0, 4  ;;  %s19_s25 = int_to_ptr.hbm [resolvable:$true] %s18_s25 }
   0x3   :  { %s30_s22 = sshll.u32 %s375_s21, 4  ;;  %s376_s26 = smov 64   ;;  %s31_s22 = int_to_ptr.vmem [resolvable:$true] %s30_s22 }
   0x4   :  { %s377_s27 = smov 4   ;;  %s378_s28 = smov [#allocation2]  }
   0x5   :  { %36 = dma.hbm_to_vmem [thread:$0]  %s29_s20, 256, %s31_s22, [#allocation6], %s376_s26, %s376_s26, %s377_s27  }
   0x6   :  { %s20_s29 = sshll.u32 %s378_s28, 4  ;;  %s43_s7 = sshll.u32 %s432_s3, 4  ;;  %s21_s29 = int_to_ptr.vmem [resolvable:$true] %s20_s29  ;;  %s44_s7 = int_to_ptr.hbm [resolvable:$true] %s43_s7 }
   0x7   :  { %23 = dma.hbm_to_vmem [thread:$0]  %s19_s25, 128, %s21_s29, [#allocation3]  }
   0x8   :  { %s379_s1 = smov [#allocation7]  }
   0x9   :  { %s45_s8 = sshll.u32 %s379_s1, 4  ;;  %s46_s8 = int_to_ptr.vmem [resolvable:$true] %s45_s8 }
   0xa   :  { %51 = dma.hbm_to_vmem [thread:$0]  %s44_s7, 1024, %s46_s8, [#allocation6], %s376_s26, %s376_s26, %s377_s27  }
   0xb   :  { %369 = dma.done.wait [#allocation3], 128  }
   0xc   :  { %370 = vsyncadd [#allocation3], 4294967168 }
   0xd   :  { %371 = dma.done.wait [#allocation6], 1280  }
   0xe   :  { %372 = vsyncadd [#allocation6], 4294966016  ;;  %v252_v0 = vld [vmem:[#allocation5 + $0x8] sm:$0xff]  ;;  %v251_v2 = vld [vmem:[#allocation5] sm:$0xff]  ;;  %vm89_vm0 = vcmask 261120   ;;  %s380_s11 = smov [#allocation8]  }
   0xf   :  { %v260_v1 = vld [vmem:[#allocation7 + $0x38] sm:$0xff]  ;;  %99 = vmatpush.bf16.msra.mxu0 %v252_v0  ;;  %v67_v3 = vld [vmem:[#allocation2] sm:$0xff]  ;;  %v259_v4 = vld [vmem:[#allocation7 + $0x30] sm:$0xff]  ;;  %s197_s12 = sshll.u32 %s380_s11, 4  ;;  %s198_s12 = int_to_ptr.vmem [resolvable:$true] %s197_s12 }
  0x10   :  { %176 = vmatpush.bf16.msra.mxu1 %v260_v1  ;;  %v68_v5 = vpack.c.bf16 %v67_v3, %v67_v3  ;;  %v258_v6 = vld [vmem:[#allocation7 + $0x28] sm:$0xff]  ;;  %v257_v7 = vld [vmem:[#allocation7 + $0x20] sm:$0xff]  ;;  %v256_v8 = vld [vmem:[#allocation7 + $0x18] sm:$0xff] }
  0x11   :  { %v255_v9 = vld [vmem:[#allocation7 + $0x10] sm:$0xff]  ;;  %v254_v10 = vld [vmem:[#allocation7 + $0x8] sm:$0xff]  ;;  %v253_v11 = vld [vmem:[#allocation7] sm:$0xff] }
  0x12   :  { %v267_v12 = vld [vmem:[%s431_s2] ss:$0 sm:$0xff]  ;;  %s199_s2 = sshll.u32 %s434_s5, 4  ;;  %s200_s2 = int_to_ptr.hbm [resolvable:$true] %s199_s2 }
  0x13   :  { %100 = vmatpush.bf16.msra.mxu0 %v251_v2  ;;  %v268_v18 = vld [vmem:[%s433_s4] ss:$0 sm:$0xff] }
  0x14   :  { %177 = vmatpush.bf16.msra.mxu1 %v259_v4 }
  0x16   :  { %218 = vmatmul.msk.bf16.vlgmr.msra.gmra.mxu0 %vm89_vm0, %v68_v5 }
  0x18   :  { %178 = vmatpush.bf16.msra.mxu1 %v258_v6 }
  0x1c   :  { %179 = vmatpush.bf16.msra.mxu1 %v257_v7 }
  0x20   :  { %180 = vmatpush.bf16.msra.mxu1 %v256_v8 }
  0x24   :  { %181 = vmatpush.bf16.msra.mxu1 %v255_v9 }
  0x28   :  { %182 = vmatpush.bf16.msra.mxu1 %v254_v10 }
  0x2c   :  { %183 = vmatpush.bf16.msra.mxu1 %v253_v11 }
  0x93   :  { %v102_v13 = vpop.f32.mrf.mxu0 }
  0x94   :  { %v103_v14 = vadd.f32 %v267_v12, %v102_v13 }
  0x96   :  { %269 = vtanh.f32 %v103_v14 }
  0x9b   :  { %v104_v15 = vpop.f32.mrf.mxu0 }
  0x9c   :  { %v270_v16 = vpop.eup %269 }
  0x9d   :  { %v107_v17 = vpack.c.bf16 %v270_v16, %v270_v16 }
  0x9f   :  { %184 = vmatmul.bf16.vlgmr.msra.gmra.mxu1 %v107_v17 }
 0x11c   :  { %v185_v19 = vpop.f32.mrf.mxu1 }
 0x11d   :  { %v186_v20 = vadd.f32 %v268_v18, %v185_v19 }
 0x11f   :  { %271 = vtanh.f32 %v186_v20 }
 0x124   :  { %v187_v21 = vpop.f32.mrf.mxu1 }
 0x125   :  { %v272_v22 = vpop.eup %271 }
 0x126   :  { %v190_v23 = vpack.c.bf16 %v272_v22, %v272_v22 }
 0x128   :  { %191 = vst [vmem:[#allocation8] sm:$0xf] %v190_v23 }
 0x129   :  { %202 = dma.vmem_to_hbm [thread:$0]  %s198_s12, 64, %s200_s2, [#allocation4]  }
 0x12a   :  { %373 = dma.done.wait [#allocation4], 64  }
 0x12b   :  { %374 = vsyncadd [#allocation4], 4294967232 }
 0x12c   :  { %207 = vsyncpa [#allocation3], 1 }
 0x12d   :  { %208 = vsyncpa [#allocation6], 1 }
 0x12e   :  { %209 = vsyncpa [#allocation4], 1 }

</bundles_post_ra>
